<compile_context>
chip_gen: v6e
topology: v6e:2x2x1
jax: 0.10.0
libtpu: 0.0.40
codegen_flags: <defaults>
</compile_context>

<pallas_src>
import functools

import jax
import jax.numpy as jnp
from jax.experimental import pallas as pl
from jax.experimental.pallas import tpu as pltpu


def _silu(x):
    # x * sigmoid(x); exp runs on the EUP slot.  (pl.reciprocal(..., approx=True)
    # would push the divide onto the EUP too, at ~2^-12 relative error.)
    return x * (1.0 / (1.0 + jnp.exp(-x)))


def _cpb_kernel(r_ref, w1_ref, b1_ref, w2s_ref, b2s_ref, w3_ref, b3_ref, o_ref,
                *, num_dims, num_hidden, compute_dtype):
    """One lane-tile of position pairs per grid step.

    r_ref  : (num_dims, TP)          signed-log relative offsets (feature-major)
    w1_ref : (dim, num_dims)         first Linear weight (PyTorch (out, in))
    b1_ref : (dim, 1)
    w2s_ref: (num_hidden, dim, dim)  hidden Linear weights
    b2s_ref: (num_hidden, dim, 1)
    w3_ref : (heads, dim)            output Linear weight
    b3_ref : (heads, 1)
    o_ref  : (heads, TP)             bias tile, lane-dense along the pair axis
    """
    r = r_ref[...].astype(jnp.float32)            # (num_dims, TP)
    w1 = w1_ref[...].astype(jnp.float32)          # (dim, num_dims)

    # Layer 0: K = num_dims (1..3) would waste >99% of the MXU -> VPU outer
    # products via broadcasting instead.
    h = w1[:, 0:1] * r[0:1, :]                    # (dim, TP)
    for c in range(1, num_dims):                  # static unroll, num_dims tiny
        h = h + w1[:, c:c + 1] * r[c:c + 1, :]
    h = _silu(h + b1_ref[...])

    # Hidden layers: one dense (dim, dim) @ (dim, TP) MXU matmul each.
    for l in range(num_hidden):                   # static unroll
        h = jnp.dot(w2s_ref[l].astype(compute_dtype), h.astype(compute_dtype),
                    preferred_element_type=jnp.float32) + b2s_ref[l]
        h = _silu(h)

    # Output layer: (heads, dim) @ (dim, TP).  Result is already (heads, pairs),
    # i.e. the module's 'h i j' order -> full-lane slab store, no transpose.
    out = jnp.dot(w3_ref[...].astype(compute_dtype), h.astype(compute_dtype),
                  preferred_element_type=jnp.float32) + b3_ref[...]
    o_ref[...] = out.astype(o_ref.dtype)


def _round_up(x, m):
    return (x + m - 1) // m * m


def _compute_rel_pos(dimensions, log_dist):
    """(L, L, num_dims) signed(-log) relative offsets, L = prod(dimensions)."""
    positions = [jnp.arange(d) for d in dimensions]
    grid = jnp.stack(jnp.meshgrid(*positions, indexing="ij"))      # (nd, *dims)
    grid = grid.reshape(len(dimensions), -1).T                     # (L, nd)
    rel = (grid[:, None, :] - grid[None, :, :]).astype(jnp.float32)
    if log_dist:
        rel = jnp.sign(rel) * jnp.log(jnp.abs(rel) + 1.0)
    return rel


def continuous_position_bias(params, *dimensions, log_dist=True,
                             tile_p=512, compute_dtype=jnp.float32):
    """JAX wrapper mirroring ContinuousPositionBias.forward(*dimensions)."""
    dim, num_dims = params["w1"].shape
    heads = params["w3"].shape[0]
    num_hidden = params["w2s"].shape[0]
    assert len(dimensions) == num_dims

    # Built once per shape (the analogue of the module's cached rel_pos buffer).
    rel = _compute_rel_pos(dimensions, log_dist)                   # (L, L, nd)
    L = rel.shape[0]
    P = L * L
    r = rel.reshape(P, num_dims).T                                 # (nd, P) lane-dense

    # Tile the pair axis in multiples of 128 lanes; the padded tail (if any) is
    # sliced off after the call.
    p128 = _round_up(P, 128)
    tp = min(tile_p, p128)
    p_pad = _round_up(P, tp)
    if p_pad != P:
        r = jnp.pad(r, ((0, 0), (0, p_pad - P)))

    kernel = functools.partial(_cpb_kernel, num_dims=num_dims,
                               num_hidden=num_hidden, compute_dtype=compute_dtype)
    out = pl.pallas_call(
        kernel,
        out_shape=jax.ShapeDtypeStruct((heads, p_pad), jnp.float32),
        grid=(p_pad // tp,),
        in_specs=[
            pl.BlockSpec((num_dims, tp), lambda i: (0, i)),             # rel pos
            pl.BlockSpec((dim, num_dims), lambda i: (0, 0)),            # W1
            pl.BlockSpec((dim, 1), lambda i: (0, 0)),                   # b1
            pl.BlockSpec((num_hidden, dim, dim), lambda i: (0, 0, 0)),  # W2..
            pl.BlockSpec((num_hidden, dim, 1), lambda i: (0, 0, 0)),    # b2..
            pl.BlockSpec((heads, dim), lambda i: (0, 0)),               # W3
            pl.BlockSpec((heads, 1), lambda i: (0, 0)),                 # b3
        ],
        out_specs=pl.BlockSpec((heads, tp), lambda i: (0, i)),
        compiler_params=pltpu.CompilerParams(
            # independent pair-tiles -> shard across both TCs on v7x / megacore
            dimension_semantics=("parallel",),
        ),
    )(r, params["w1"], params["b1"], params["w2s"], params["b2s"],
      params["w3"], params["b3"])

    return out[:, :P].reshape(heads, L, L)


def reference(params, *dimensions, log_dist=True):
    """Pure-JAX reference mirroring the PyTorch forward (row-vector form)."""
    rel = _compute_rel_pos(dimensions, log_dist)                   # (L, L, nd)
    hp = jax.lax.Precision.HIGHEST

    def lin(h, w, b):
        return jnp.matmul(h, w.T, precision=hp) + b[:, 0]

    h = jax.nn.silu(lin(rel, params["w1"], params["b1"]))
    for l in range(params["w2s"].shape[0]):
        h = jax.nn.silu(lin(h, params["w2s"][l], params["b2s"][l]))
    h = lin(h, params["w3"], params["b3"])
    return jnp.transpose(h, (2, 0, 1))                             # (heads, L, L)


def _make_params(key, *, dim, heads, num_dims, layers):
    """PyTorch-default-style Linear init; weights kept in (out, in) layout."""
    ks = jax.random.split(key, 2 * (layers + 1))

    def lin_init(kw, kb, out_f, in_f):
        bound = 1.0 / (in_f ** 0.5)
        w = jax.random.uniform(kw, (out_f, in_f), jnp.float32, -bound, bound)
        b = jax.random.uniform(kb, (out_f, 1), jnp.float32, -bound, bound)
        return w, b

    w1, b1 = lin_init(ks[0], ks[1], dim, num_dims)
    w2s, b2s = [], []
    for l in range(layers - 1):                   # layers >= 2 (module default 2)
        w, b = lin_init(ks[2 + 2 * l], ks[3 + 2 * l], dim, dim)
        w2s.append(w)
        b2s.append(b)
    w3, b3 = lin_init(ks[-2], ks[-1], heads, dim)
    return dict(w1=w1, b1=b1, w2s=jnp.stack(w2s), b2s=jnp.stack(b2s),
                w3=w3, b3=b3)


if __name__ == "__main__":
    key = jax.random.PRNGKey(0)
    k1, k2 = jax.random.split(key)

    dim, heads, layers = 32, 8, 2

    # num_dims=1 (the module default): forward(16) -> (heads, 16, 16)
    params = _make_params(k1, dim=dim, heads=heads, num_dims=1, layers=layers)
    out = continuous_position_bias(params, 16)
    jax.block_until_ready(out)
    ref = reference(params, 16)
    assert out.shape == (heads, 16, 16)
    assert jnp.allclose(out, ref, atol=1e-3, rtol=1e-3), \
        float(jnp.max(jnp.abs(out - ref)))

    # num_dims=2 (e.g. a 2-D spatial bias): forward(4, 4) -> (heads, 16, 16)
    params2 = _make_params(k2, dim=dim, heads=heads, num_dims=2, layers=layers)
    out2 = continuous_position_bias(params2, 4, 4)
    jax.block_until_ready(out2)
    ref2 = reference(params2, 4, 4)
    assert out2.shape == (heads, 16, 16)
    assert jnp.allclose(out2, ref2, atol=1e-3, rtol=1e-3), \
        float(jnp.max(jnp.abs(out2 - ref2)))

    print("KERNEL_OK")
</pallas_src>

<mosaic_0001>
module attributes {stable_mosaic.version = 11 : i64} {
  func.func @_cpb_kernel(%arg0: i32, %arg1: memref<1x256xf32, #tpu.memory_space<vmem>>, %arg2: memref<32x1xf32, #tpu.memory_space<vmem>>, %arg3: memref<32x1xf32, #tpu.memory_space<vmem>>, %arg4: memref<1x32x32xf32, #tpu.memory_space<vmem>>, %arg5: memref<1x32x1xf32, #tpu.memory_space<vmem>>, %arg6: memref<8x32xf32, #tpu.memory_space<vmem>>, %arg7: memref<8x1xf32, #tpu.memory_space<vmem>>, %arg8: memref<8x256xf32, #tpu.memory_space<vmem>>) attributes {dimension_semantics = [#tpu.dimension_semantics<parallel>], iteration_bounds = array<i64: 1>, scalar_prefetch = 0 : i64, scratch_operands = 0 : i64, tpu.core_type = #tpu.core_type<tc>, window_params = [{transform_indices = @transform_0, window_bounds = array<i64: 1, 256>}, {pipeline_mode = #tpu.pipeline_mode<synchronous>, transform_indices = @transform_1, window_bounds = array<i64: 32, 1>}, {pipeline_mode = #tpu.pipeline_mode<synchronous>, transform_indices = @transform_2, window_bounds = array<i64: 32, 1>}, {pipeline_mode = #tpu.pipeline_mode<synchronous>, transform_indices = @transform_3, window_bounds = array<i64: 1, 32, 32>}, {pipeline_mode = #tpu.pipeline_mode<synchronous>, transform_indices = @transform_4, window_bounds = array<i64: 1, 32, 1>}, {pipeline_mode = #tpu.pipeline_mode<synchronous>, transform_indices = @transform_5, window_bounds = array<i64: 8, 32>}, {pipeline_mode = #tpu.pipeline_mode<synchronous>, transform_indices = @transform_6, window_bounds = array<i64: 8, 1>}, {transform_indices = @transform_7, window_bounds = array<i64: 8, 256>}]} {
    %c0 = arith.constant 0 : index
    %c0_0 = arith.constant 0 : index
    %0 = vector.load %arg1[%c0, %c0_0] : memref<1x256xf32, #tpu.memory_space<vmem>>, vector<1x256xf32>
    %c0_1 = arith.constant 0 : index
    %c0_2 = arith.constant 0 : index
    %1 = vector.load %arg2[%c0_1, %c0_2] : memref<32x1xf32, #tpu.memory_space<vmem>>, vector<32x1xf32>
    %2 = vector.broadcast %1 : vector<32x1xf32> to vector<32x256xf32>
    %3 = vector.broadcast %0 : vector<1x256xf32> to vector<32x256xf32>
    %4 = arith.mulf %2, %3 : vector<32x256xf32>
    %c0_3 = arith.constant 0 : index
    %c0_4 = arith.constant 0 : index
    %5 = vector.load %arg3[%c0_3, %c0_4] : memref<32x1xf32, #tpu.memory_space<vmem>>, vector<32x1xf32>
    %6 = vector.broadcast %5 : vector<32x1xf32> to vector<32x256xf32>
    %7 = arith.addf %4, %6 : vector<32x256xf32>
    %cst = arith.constant 0.000000e+00 : f32
    %8 = vector.broadcast %cst : f32 to vector<32x256xf32>
    %9 = arith.subf %8, %7 : vector<32x256xf32>
    %10 = math.exp %9 : vector<32x256xf32>
    %cst_5 = arith.constant 1.000000e+00 : f32
    %11 = vector.broadcast %cst_5 : f32 to vector<32x256xf32>
    %12 = arith.addf %11, %10 : vector<32x256xf32>
    %cst_6 = arith.constant 1.000000e+00 : f32
    %13 = vector.broadcast %cst_6 : f32 to vector<32x256xf32>
    %14 = arith.divf %13, %12 : vector<32x256xf32>
    %15 = arith.mulf %7, %14 : vector<32x256xf32>
    %c0_7 = arith.constant 0 : index
    %c0_8 = arith.constant 0 : index
    %c0_9 = arith.constant 0 : index
    %16 = vector.load %arg4[%c0_7, %c0_8, %c0_9] : memref<1x32x32xf32, #tpu.memory_space<vmem>>, vector<1x32x32xf32>
    %17 = vector.shape_cast %16 : vector<1x32x32xf32> to vector<32x32xf32>
    %cst_10 = arith.constant dense<0.000000e+00> : vector<32x256xf32>
    %18 = tpu.matmul %17, %15, %cst_10 {dimension_numbers = #tpu.dot_dimension_numbers<[1], [0], [0], [1], [0, 0, 1, 1], [], []>} : vector<32x32xf32>, vector<32x256xf32>, vector<32x256xf32> -> vector<32x256xf32>
    %c0_11 = arith.constant 0 : index
    %c0_12 = arith.constant 0 : index
    %c0_13 = arith.constant 0 : index
    %19 = vector.load %arg5[%c0_11, %c0_12, %c0_13] : memref<1x32x1xf32, #tpu.memory_space<vmem>>, vector<1x32x1xf32>
    %20 = vector.shape_cast %19 : vector<1x32x1xf32> to vector<32x1xf32>
    %21 = vector.broadcast %20 : vector<32x1xf32> to vector<32x256xf32>
    %22 = arith.addf %18, %21 : vector<32x256xf32>
    %cst_14 = arith.constant 0.000000e+00 : f32
    %23 = vector.broadcast %cst_14 : f32 to vector<32x256xf32>
    %24 = arith.subf %23, %22 : vector<32x256xf32>
    %25 = math.exp %24 : vector<32x256xf32>
    %cst_15 = arith.constant 1.000000e+00 : f32
    %26 = vector.broadcast %cst_15 : f32 to vector<32x256xf32>
    %27 = arith.addf %26, %25 : vector<32x256xf32>
    %cst_16 = arith.constant 1.000000e+00 : f32
    %28 = vector.broadcast %cst_16 : f32 to vector<32x256xf32>
    %29 = arith.divf %28, %27 : vector<32x256xf32>
    %30 = arith.mulf %22, %29 : vector<32x256xf32>
    %c0_17 = arith.constant 0 : index
    %c0_18 = arith.constant 0 : index
    %31 = vector.load %arg6[%c0_17, %c0_18] : memref<8x32xf32, #tpu.memory_space<vmem>>, vector<8x32xf32>
    %cst_19 = arith.constant dense<0.000000e+00> : vector<8x256xf32>
    %32 = tpu.matmul %31, %30, %cst_19 {dimension_numbers = #tpu.dot_dimension_numbers<[1], [0], [0], [1], [0, 0, 1, 1], [], []>} : vector<8x32xf32>, vector<32x256xf32>, vector<8x256xf32> -> vector<8x256xf32>
    %c0_20 = arith.constant 0 : index
    %c0_21 = arith.constant 0 : index
    %33 = vector.load %arg7[%c0_20, %c0_21] : memref<8x1xf32, #tpu.memory_space<vmem>>, vector<8x1xf32>
    %34 = vector.broadcast %33 : vector<8x1xf32> to vector<8x256xf32>
    %35 = arith.addf %32, %34 : vector<8x256xf32>
    %c0_22 = arith.constant 0 : index
    %c0_23 = arith.constant 0 : index
    %36 = vector.load %arg8[%c0_22, %c0_23] : memref<8x256xf32, #tpu.memory_space<vmem>>, vector<8x256xf32>
    tpu.vector_store %arg8[%c0_22, %c0_23], %35 {strides = array<i32>} : memref<8x256xf32, #tpu.memory_space<vmem>>, vector<8x256xf32>,
    return
  }
  func.func @transform_0(%arg0: i32) -> (i32, i32) {
    %c0_i32 = arith.constant 0 : i32
    %c0_i32_0 = arith.constant 0 : i32
    return %c0_i32, %arg0 : i32, i32
  }
  func.func @transform_1(%arg0: i32) -> (i32, i32) {
    %c0_i32 = arith.constant 0 : i32
    %c0_i32_0 = arith.constant 0 : i32
    %c0_i32_1 = arith.constant 0 : i32
    return %c0_i32, %c0_i32_0 : i32, i32
  }
  func.func @transform_2(%arg0: i32) -> (i32, i32) {
    %c0_i32 = arith.constant 0 : i32
    %c0_i32_0 = arith.constant 0 : i32
    %c0_i32_1 = arith.constant 0 : i32
    return %c0_i32, %c0_i32_0 : i32, i32
  }
  func.func @transform_3(%arg0: i32) -> (i32, i32, i32) {
    %c0_i32 = arith.constant 0 : i32
    %c0_i32_0 = arith.constant 0 : i32
    %c0_i32_1 = arith.constant 0 : i32
    %c0_i32_2 = arith.constant 0 : i32
    return %c0_i32, %c0_i32_0, %c0_i32_1 : i32, i32, i32
  }
  func.func @transform_4(%arg0: i32) -> (i32, i32, i32) {
    %c0_i32 = arith.constant 0 : i32
    %c0_i32_0 = arith.constant 0 : i32
    %c0_i32_1 = arith.constant 0 : i32
    %c0_i32_2 = arith.constant 0 : i32
    return %c0_i32, %c0_i32_0, %c0_i32_1 : i32, i32, i32
  }
  func.func @transform_5(%arg0: i32) -> (i32, i32) {
    %c0_i32 = arith.constant 0 : i32
    %c0_i32_0 = arith.constant 0 : i32
    %c0_i32_1 = arith.constant 0 : i32
    return %c0_i32, %c0_i32_0 : i32, i32
  }
  func.func @transform_6(%arg0: i32) -> (i32, i32) {
    %c0_i32 = arith.constant 0 : i32
    %c0_i32_0 = arith.constant 0 : i32
    %c0_i32_1 = arith.constant 0 : i32
    return %c0_i32, %c0_i32_0 : i32, i32
  }
  func.func @transform_7(%arg0: i32) -> (i32, i32) {
    %c0_i32 = arith.constant 0 : i32
    %c0_i32_0 = arith.constant 0 : i32
    return %c0_i32, %arg0 : i32, i32
  }
}

</mosaic_0001>

<bundles_post_ra>
// kernel: tpu_custom_call.1
= control target key start
LH: loop header
LB: loop body
LE: loop exit
PB: predicated region body
PF: predicated region fallthrough
CT: control target
= control target key end

     0   :  { %v538_v2 = vmov 0   ;;  %s687_s0 = inlined_call_operand.vmem [shape: f32[1,256], index: 0, kind: input, shape index: {}]   ;;  %s688_s1 = inlined_call_operand.vmem [shape: f32[32,1], index: 1, kind: input, shape index: {}]   ;;  %s689_s2 = inlined_call_operand.vmem [shape: f32[32,1], index: 2, kind: input, shape index: {}]   ;;  %s690_s3 = inlined_call_operand.vmem [shape: f32[1,32,32], index: 3, kind: input, shape index: {}]   ;;  %s691_s4 = inlined_call_operand.vmem [shape: f32[1,32,1], index: 4, kind: input, shape index: {}]   ;;  %s692_s5 = inlined_call_operand.vmem [shape: f32[8,32], index: 5, kind: input, shape index: {}]   ;;  %s693_s6 = inlined_call_operand.vmem [shape: f32[8,1], index: 6, kind: input, shape index: {}]   ;;  %s694_s7 = inlined_call_operand.hbm [shape: f32[8,256], index: 7, kind: output, shape index: {}]  }
   0x1   :  { %v74_v0 = vld [vmem:[%s689_s2 + $0x18] sm:$0xff]  ;;  %451 = vset.pattern.permute.xlu1 %v538_v2  ;;  %450 = vset.pattern.permute.xlu0 %v538_v2  ;;  %v30_v3 = vld [vmem:[%s688_s1 + $0x10] sm:$0xff]  ;;  %v29_v4 = vld [vmem:[%s688_s1 + $0x8] sm:$0xff] }
   0x2   :  { %v31_v1 = vld [vmem:[%s688_s1 + $0x18] sm:$0xff]  ;;  %92 = vperm.xlu1 %451, %v74_v0  }
   0x3   :  { %49 = vperm.xlu0 %450, %v31_v1  }
   0x4   :  { %12 = vsyncpa [#allocation3], 0  ;;  %v73_v5 = vld [vmem:[%s689_s2 + $0x10] sm:$0xff]  ;;  %v28_v6 = vld [vmem:[%s688_s1] sm:$0xff]  ;;  %v539_v14 = vmov 0.0   ;;  %v53_v15 = vlaneseq  ;;  %vm187_vm0 = vcmask 261120  }
   0x5   :  { %v72_v7 = vld [vmem:[%s689_s2 + $0x8] sm:$0xff]  ;;  %v71_v8 = vld [vmem:[%s689_s2] sm:$0xff]  ;;  %v166_v9 = vld [vmem:[%s691_s4 + $0x18] sm:$0xff]  ;;  %264 = vmatprep.mubr.f32.mxu0 %v539_v14  ;;  %419 = vmatprep.mubr.f32.mxu1 %v539_v14  ;;  %s540_s10 = smov [#allocation2]  }
   0x6   :  { %39 = vperm.xlu1 %451, %v29_v4   ;;  %v165_v10 = vld [vmem:[%s691_s4 + $0x10] sm:$0xff]  ;;  %v164_v11 = vld [vmem:[%s691_s4 + $0x8] sm:$0xff]  ;;  %v163_v12 = vld [vmem:[%s691_s4] sm:$0xff]  ;;  %v54_v16 = vshrl.u32 %v53_v15, 7  ;;  %s434_s11 = sshll.u32 %s540_s10, 4  ;;  %s435_s11 = int_to_ptr.vmem [resolvable:$true] %s434_s11 }
   0x7   :  { %44 = vperm.xlu0 %450, %v30_v3   ;;  %v346_v13 = vld [vmem:[%s693_s6] sm:$0xff]  ;;  %s516_s12 = scalar_lea.vmem %s435_s11, 256  ;;  %p521_p1 = scmp.lt.s32.totalorder %s435_s11, %s435_s11 }
   0x8   :  { %v55_v17 = vsub.s32 0, %v54_v16  ;;  %v59_v18 = vsub.s32 1, %v54_v16  ;;  %v27_v19 = vld [vmem:[%s687_s0] sm:$0x3]  ;;  %p517_p0 = scmp.ne.s32.totalorder %s435_s11, %s516_s12  ;;  %p522_p2 = scmp.lt.s32.totalorder %s516_s12, %s516_s12 }
   0xa   :  { %34 = vperm.xlu1 %451, %v28_v6   ;;  %v56_v20 = vrot.slane %v27_v19, %v55_v17  ;;  %v60_v21 = vrot.slane %v27_v19, %v59_v18  ;;  %p523_p3 = por %p522_p2, %p521_p1 }
   0xb   :  { %87 = vperm.xlu0 %450, %v73_v5  }
   0xc   :  { %p524_p4 = pnand %p523_p3, %p517_p0 }
   0xe   :  { %77 = vperm.xlu1 %451, %v71_v8  }
   0xf   :  { %82 = vperm.xlu0 %450, %v72_v7  }
  0x12   :  { %179 = vperm.xlu1 %451, %v165_v10  }
  0x13   :  { %184 = vperm.xlu0 %450, %v166_v9  }
  0x16   :  { %169 = vperm.xlu1 %451, %v163_v12  }
  0x17   :  { %174 = vperm.xlu0 %450, %v164_v11  }
  0x1b   :  { %349 = vperm.xlu0 %450, %v346_v13  }
  0x7d   :  { %v93_v22 = vpop.permute.xlu1 %92 }
  0x7e   :  { %v50_v23 = vpop.permute.xlu0 %49 }
  0x7f   :  { %v69_v24 = vmul.f32 %v56_v20, %v50_v23  ;;  %v70_v25 = vmul.f32 %v60_v21, %v50_v23 }
  0x81   :  { %v625_v26 = vadd.f32 %v93_v22, %v70_v25  ;;  %v627_v27 = vadd.f32 %v93_v22, %v69_v24  ;;  %v40_v29 = vpop.permute.xlu1 %39 }
  0x82   :  { %v45_v28 = vpop.permute.xlu0 %44  ;;  %v65_v40 = vmul.f32 %v56_v20, %v40_v29  ;;  %v66_v41 = vmul.f32 %v60_v21, %v40_v29 }
  0x83   :  { %v110_v30 = vsub.f32 0.0, %v625_v26  ;;  %v109_v31 = vsub.f32 0.0, %v627_v27  ;;  %v67_v32 = vmul.f32 %v56_v20, %v45_v28  ;;  %v68_v33 = vmul.f32 %v60_v21, %v45_v28 }
  0x85   :  { %v35_v35 = vpop.permute.xlu1 %34  ;;  %v125_v36 = vmul.f32 1.442695, %v110_v30  ;;  %v123_v37 = vmul.f32 1.442695, %v109_v31 }
  0x86   :  { %v88_v34 = vpop.permute.xlu0 %87  ;;  %v63_v44 = vmul.f32 %v56_v20, %v35_v35  ;;  %v64_v45 = vmul.f32 %v60_v21, %v35_v35 }
  0x87   :  { %v631_v38 = vadd.f32 %v88_v34, %v67_v32  ;;  %v633_v39 = vadd.f32 %v88_v34, %v68_v33  ;;  %452 = vpow2.f32 %v125_v36  ;;  %v160_v32 = vld [vmem:[%s690_s3 + $0x8] sm:$0xff]  ;;  %v161_v33 = vld [vmem:[%s690_s3 + $0x10] sm:$0xff]  ;;  %v162_v34 = vld [vmem:[%s690_s3 + $0x18] sm:$0xff] }
  0x88   :  { %454 = vpow2.f32 %v123_v37 }
  0x89   :  { %v107_v42 = vsub.f32 0.0, %v631_v38  ;;  %v108_v43 = vsub.f32 0.0, %v633_v39  ;;  %v78_v47 = vpop.permute.xlu1 %77 }
  0x8a   :  { %v83_v46 = vpop.permute.xlu0 %82  ;;  %v95_v52 = vadd.f32 %v78_v47, %v63_v44  ;;  %v96_v53 = vadd.f32 %v78_v47, %v64_v45 }
  0x8b   :  { %v119_v48 = vmul.f32 1.442695, %v107_v42  ;;  %v121_v49 = vmul.f32 1.442695, %v108_v43  ;;  %v97_v50 = vadd.f32 %v83_v46, %v65_v40  ;;  %v98_v51 = vadd.f32 %v83_v46, %v66_v41 }
  0x8c   :  { %v103_v56 = vsub.f32 0.0, %v95_v52  ;;  %v104_v57 = vsub.f32 0.0, %v96_v53 }
  0x8d   :  { %456 = vpow2.f32 %v119_v48  ;;  %v105_v54 = vsub.f32 0.0, %v97_v50  ;;  %v106_v55 = vsub.f32 0.0, %v98_v51  ;;  %v180_v35 = vpop.permute.xlu1 %179 }
  0x8e   :  { %458 = vpow2.f32 %v121_v49  ;;  %v111_v60 = vmul.f32 1.442695, %v103_v56  ;;  %v113_v61 = vmul.f32 1.442695, %v104_v57  ;;  %v185_v36 = vpop.permute.xlu0 %184 }
  0x8f   :  { %v115_v58 = vmul.f32 1.442695, %v105_v54  ;;  %v117_v59 = vmul.f32 1.442695, %v106_v55 }
  0x91   :  { %460 = vpow2.f32 %v115_v58 }
  0x92   :  { %462 = vpow2.f32 %v117_v59  ;;  %v175_v42 = vpop.permute.xlu0 %174 }
  0x93   :  { %464 = vpow2.f32 %v111_v60 }
  0x94   :  { %466 = vpow2.f32 %v113_v61  ;;  %v453_v62 = vpop.eup %452 }
  0x95   :  { %v455_v63 = vpop.eup %454  ;;  %v134_v0 = vadd.f32 1.0, %v453_v62 }
  0x96   :  { %v133_v1 = vadd.f32 1.0, %v455_v63 }
  0x97   :  { %468 = vrcp.f32 %v134_v0 }
  0x98   :  { %470 = vrcp.f32 %v133_v1 }
  0x9a   :  { %v457_v2 = vpop.eup %456 }
  0x9b   :  { %v459_v3 = vpop.eup %458  ;;  %v131_v4 = vadd.f32 1.0, %v457_v2 }
  0x9c   :  { %v132_v5 = vadd.f32 1.0, %v459_v3 }
  0x9d   :  { %472 = vrcp.f32 %v131_v4 }
  0x9e   :  { %v461_v6 = vpop.eup %460  ;;  %474 = vrcp.f32 %v132_v5 }
  0x9f   :  { %v463_v7 = vpop.eup %462  ;;  %v129_v8 = vadd.f32 1.0, %v461_v6 }
  0xa0   :  { %v465_v9 = vpop.eup %464  ;;  %v130_v10 = vadd.f32 1.0, %v463_v7 }
  0xa1   :  { %v467_v11 = vpop.eup %466  ;;  %476 = vrcp.f32 %v129_v8  ;;  %v127_v12 = vadd.f32 1.0, %v465_v9 }
  0xa2   :  { %478 = vrcp.f32 %v130_v10  ;;  %v128_v13 = vadd.f32 1.0, %v467_v11 }
  0xa3   :  { %480 = vrcp.f32 %v127_v12 }
  0xa4   :  { %482 = vrcp.f32 %v128_v13  ;;  %v469_v15 = vpop.eup %468 }
  0xa5   :  { %v471_v16 = vpop.eup %470  ;;  %v158_v17 = vmul.f32 %v469_v15, %v625_v26 }
  0xa6   :  { %v157_v18 = vmul.f32 %v471_v16, %v627_v27  ;;  %v159_v27 = vld [vmem:[%s690_s3] sm:$0xff] }
  0xa7   :  { %224 = vmatprep.subr.mxu0 %v158_v17 }
  0xa8   :  { %225 = vmatpush1.msra.mxu0 %v157_v18 }
  0xaa   :  { %v473_v19 = vpop.eup %472 }
  0xab   :  { %v475_v20 = vpop.eup %474  ;;  %v155_v21 = vmul.f32 %v473_v19, %v631_v38  ;;  %v170_v38 = vpop.permute.xlu1 %169 }
  0xac   :  { %v156_v22 = vmul.f32 %v475_v20, %v633_v39 }
  0xae   :  { %v477_v23 = vpop.eup %476  ;;  %226 = vmatprep.subr.mxu0 %v156_v22 }
  0xaf   :  { %v479_v24 = vpop.eup %478  ;;  %v153_v25 = vmul.f32 %v477_v23, %v97_v50  ;;  %227 = vmatpush1.msra.mxu0 %v155_v21 }
  0xb0   :  { %v481_v28 = vpop.eup %480  ;;  %v154_v29 = vmul.f32 %v479_v24, %v98_v51 }
  0xb1   :  { %v483_v30 = vpop.eup %482  ;;  %v151_v26 = vmul.f32 %v481_v28, %v95_v52 }
  0xb2   :  { %v152_v31 = vmul.f32 %v483_v30, %v96_v53  ;;  %228 = vmatprep.subr.mxu0 %v154_v29 }
  0xb3   :  { %229 = vmatpush1.msra.mxu0 %v153_v25 }
  0xb4   :  { %230 = vmatprep.subr.mxu0 %v152_v31 }
  0xb5   :  { %231 = vmatpush1.msra.mxu0 %v151_v26 }
  0xb6   :  { %442 = vmatmul.mubr.msk.f32.vlgmr.msra.gmra.mxu0 %vm187_vm0, %v159_v27 }
  0xb7   :  { %270 = vmatprep.mubr.f32.mxu0 %v539_v14 }
  0xba   :  { %443 = vmatmul.mubr.msk.f32.gmra.mxu0 %vm187_vm0, %v160_v32 }
  0xbb   :  { %276 = vmatprep.mubr.f32.mxu0 %v539_v14 }
  0xbe   :  { %444 = vmatmul.mubr.msk.f32.gmra.mxu0 %vm187_vm0, %v161_v33 }
  0xbf   :  { %282 = vmatprep.mubr.f32.mxu0 %v539_v14 }
  0xc2   :  { %445 = vmatmul.mubr.msk.f32.gmra.mxu0 %vm187_vm0, %v162_v34 }
 0x176   :  { %v266_v37 = vpop.f32.mrf.mxu0 }
 0x177   :  { %v670_v49 = vadd.f32 %v266_v37, %v170_v38 }
 0x178   :  { %v268_v39 = vpop.f32.mrf.mxu0 }
 0x179   :  { %v660_v40 = vadd.f32 %v268_v39, %v170_v38  ;;  %v289_v59 = vsub.f32 0.0, %v670_v49  ;;  %v345_v39 = vld [vmem:[%s692_s5] sm:$0xff] }
 0x17a   :  { %v272_v41 = vpop.f32.mrf.mxu0 }
 0x17b   :  { %v290_v44 = vsub.f32 0.0, %v660_v40  ;;  %v665_v14 = vadd.f32 %v272_v41, %v175_v42  ;;  %v297_v4 = vmul.f32 1.442695, %v289_v59  ;;  %v350_v41 = vpop.permute.xlu0 %349 }
 0x17c   :  { %v274_v43 = vpop.f32.mrf.mxu0 }
 0x17d   :  { %v663_v45 = vadd.f32 %v274_v43, %v175_v42  ;;  %v299_v51 = vmul.f32 1.442695, %v290_v44  ;;  %v291_v54 = vsub.f32 0.0, %v665_v14 }
 0x17e   :  { %v278_v46 = vpop.f32.mrf.mxu0 }
 0x17f   :  { %v292_v47 = vsub.f32 0.0, %v663_v45  ;;  %v668_v48 = vadd.f32 %v278_v46, %v180_v35  ;;  %484 = vpow2.f32 %v299_v51  ;;  %v301_v1 = vmul.f32 1.442695, %v291_v54 }
 0x180   :  { %v280_v50 = vpop.f32.mrf.mxu0 }
 0x181   :  { %v293_v52 = vsub.f32 0.0, %v668_v48  ;;  %v281_v53 = vadd.f32 %v280_v50, %v180_v35  ;;  %v303_v55 = vmul.f32 1.442695, %v292_v47 }
 0x182   :  { %v284_v56 = vpop.f32.mrf.mxu0 }
 0x183   :  { %v294_v57 = vsub.f32 0.0, %v281_v53  ;;  %v285_v58 = vadd.f32 %v284_v56, %v185_v36  ;;  %v305_v60 = vmul.f32 1.442695, %v293_v52  ;;  %486 = vpow2.f32 %v303_v55 }
 0x184   :  { %v286_v61 = vpop.f32.mrf.mxu0 }
 0x185   :  { %v307_v62 = vmul.f32 1.442695, %v294_v57  ;;  %v295_v63 = vsub.f32 0.0, %v285_v58  ;;  %v287_v0 = vadd.f32 %v286_v61, %v185_v36 }
 0x187   :  { %488 = vpow2.f32 %v307_v62  ;;  %v309_v2 = vmul.f32 1.442695, %v295_v63  ;;  %v296_v3 = vsub.f32 0.0, %v287_v0 }
 0x188   :  { %490 = vpow2.f32 %v305_v60 }
 0x189   :  { %492 = vpow2.f32 %v309_v2  ;;  %v311_v5 = vmul.f32 1.442695, %v296_v3 }
 0x18a   :  { %494 = vpow2.f32 %v301_v1 }
 0x18b   :  { %496 = vpow2.f32 %v311_v5 }
 0x18c   :  { %498 = vpow2.f32 %v297_v4  ;;  %v485_v6 = vpop.eup %484 }
 0x18d   :  { %v314_v21 = vadd.f32 1.0, %v485_v6 }
 0x190   :  { %v487_v7 = vpop.eup %486 }
 0x191   :  { %v316_v18 = vadd.f32 1.0, %v487_v7 }
 0x194   :  { %v489_v8 = vpop.eup %488 }
 0x195   :  { %v491_v9 = vpop.eup %490  ;;  %v318_v10 = vadd.f32 1.0, %v489_v8 }
 0x196   :  { %v493_v11 = vpop.eup %492  ;;  %v317_v16 = vadd.f32 1.0, %v491_v9 }
 0x197   :  { %v495_v12 = vpop.eup %494  ;;  %v319_v13 = vadd.f32 1.0, %v493_v11  ;;  %500 = vrcp.f32 %v318_v10 }
 0x198   :  { %v497_v15 = vpop.eup %496  ;;  %v315_v20 = vadd.f32 1.0, %v495_v12 }
 0x199   :  { %v499_v17 = vpop.eup %498  ;;  %v320_v19 = vadd.f32 1.0, %v497_v15  ;;  %502 = vrcp.f32 %v319_v13 }
 0x19a   :  { %v313_v22 = vadd.f32 1.0, %v499_v17 }
 0x19b   :  { %504 = vrcp.f32 %v320_v19 }
 0x19c   :  { %506 = vrcp.f32 %v317_v16 }
 0x19d   :  { %508 = vrcp.f32 %v316_v18 }
 0x19e   :  { %510 = vrcp.f32 %v315_v20 }
 0x19f   :  { %512 = vrcp.f32 %v314_v21 }
 0x1a0   :  { %514 = vrcp.f32 %v313_v22 }
 0x1a4   :  { %v501_v23 = vpop.eup %500 }
 0x1a5   :  { %v342_v27 = vmul.f32 %v501_v23, %v281_v53 }
 0x1a6   :  { %v503_v24 = vpop.eup %502 }
 0x1a7   :  { %v343_v31 = vmul.f32 %v503_v24, %v285_v58 }
 0x1a8   :  { %v505_v25 = vpop.eup %504 }
 0x1a9   :  { %v507_v28 = vpop.eup %506  ;;  %v344_v29 = vmul.f32 %v505_v25, %v287_v0 }
 0x1aa   :  { %v509_v30 = vpop.eup %508  ;;  %v341_v33 = vmul.f32 %v507_v28, %v668_v48 }
 0x1ab   :  { %v511_v26 = vpop.eup %510  ;;  %379 = vmatprep.subr.mxu1 %v344_v29  ;;  %v340_v35 = vmul.f32 %v509_v30, %v663_v45 }
 0x1ac   :  { %v513_v32 = vpop.eup %512  ;;  %380 = vmatpush1.msra.mxu1 %v343_v31  ;;  %v339_v36 = vmul.f32 %v511_v26, %v665_v14 }
 0x1ad   :  { %v515_v34 = vpop.eup %514  ;;  %381 = vmatprep.subr.mxu1 %v342_v27  ;;  %v338_v37 = vmul.f32 %v513_v32, %v660_v40 }
 0x1ae   :  { %382 = vmatpush1.msra.mxu1 %v341_v33  ;;  %v337_v38 = vmul.f32 %v515_v34, %v670_v49 }
 0x1af   :  { %383 = vmatprep.subr.mxu1 %v340_v35 }
 0x1b0   :  { %384 = vmatpush1.msra.mxu1 %v339_v36 }
 0x1b1   :  { %385 = vmatprep.subr.mxu1 %v338_v37 }
 0x1b2   :  { %386 = vmatpush1.msra.mxu1 %v337_v38 }
 0x1b3   :  { %446 = vmatmul.mubr.msk.f32.vlgmr.msra.gmra.mxu1 %vm187_vm0, %v345_v39 }
 0x273   :  { %v421_v42 = vpop.f32.mrf.mxu1 }
 0x274   :  { %v422_v43 = vadd.f32 %v421_v42, %v350_v41 }
 0x275   :  { %v423_v44 = vpop.f32.mrf.mxu1 }
 0x276   :  { %426 = vst [vmem:[#allocation2] sm:$0xff] %v422_v43  ;;  %v424_v40 = vadd.f32 %v423_v44, %v350_v41 }
 0x278   :  { %427 = vst [vmem:[#allocation2 + $0x8] sm:$0xff] %v424_v40 }
 0x279   :  { %527 = shalt.err (!%p524_p4)
}
 0x27a   :  { %437 = dma.vmem_to_hbm [thread:$0]  %s435_s11, 256, %s694_s7, [#allocation3]  }
 0x27b   :  { %536 = dma.done.wait [#allocation3], 256  }
 0x27c   :  { %537 = vsyncadd [#allocation3], 4294967040 }
 0x27d   :  { %441 = vsyncpa [#allocation3], 1 }

</bundles_post_ra>
